<compile_context>
chip_gen: v7x
topology: tpu7x:2x2x1
jax: 0.10.0
libtpu: 0.0.40
codegen_flags: <defaults>
</compile_context>

<pallas_src>
import functools

import jax
import jax.numpy as jnp
from jax.experimental import pallas as pl
from jax.experimental.pallas import tpu as pltpu


def _channel_projection_kernel(z0_ref, w1_ref, b1_ref, w2_ref, b2_ref, o_ref,
                               *, conv_channels, groups, eps):
    # z0_ref / o_ref : (TB, C, H*W) VMEM tiles (lane-dense last dim)
    # w1_ref : (2*cc, cc), b1_ref : (2*cc, 1)
    # w2_ref : (cc, 2*cc), b2_ref : (cc, 1)
    tb, c, hw = z0_ref.shape
    cc = conv_channels
    cpg = c // groups
    inv_n = 1.0 / float(c * hw)

    # --- LayerNorm stats over [C, HW], per sample, single fused pass (f32 acc) ---
    xf = z0_ref[...].astype(jnp.float32)                       # (TB, C, HW)
    s = jnp.sum(xf, axis=(1, 2), keepdims=True)                # (TB, 1, 1)
    ss = jnp.sum(xf * xf, axis=(1, 2), keepdims=True)          # (TB, 1, 1)
    mean = s * inv_n
    var = ss * inv_n - mean * mean
    rstd = jax.lax.rsqrt(var + eps)
    # xf is not reused below; slices of z0_ref are re-read from VMEM where needed.

    # --- first cc channels: normalize, then PointWiseMLP (1x1 convs = matmuls) ---
    z1n = (z0_ref[:, :cc, :].astype(jnp.float32) - mean) * rstd     # (TB, cc, HW)

    # small cc keeps f32 (MXU mostly idle anyway); large cc runs bf16 at native rate
    mm_dtype = jnp.bfloat16 if cc >= 128 else jnp.float32
    w1 = jnp.broadcast_to(w1_ref[...].astype(mm_dtype), (tb, 2 * cc, cc))
    w2 = jnp.broadcast_to(w2_ref[...].astype(mm_dtype), (tb, cc, 2 * cc))

    h1 = jnp.einsum('boi,bil->bol', w1, z1n.astype(mm_dtype),
                    preferred_element_type=jnp.float32)             # (TB, 2cc, HW)
    h1 = h1 + b1_ref[...].astype(jnp.float32)                       # lane broadcast
    h1 = h1 * jax.nn.sigmoid(h1)                                    # SiLU (EUP)
    z1o = jnp.einsum('boi,bil->bol', w2, h1.astype(mm_dtype),
                     preferred_element_type=jnp.float32)            # (TB, cc, HW)
    z1o = z1o + b2_ref[...].astype(jnp.float32)

    # --- remaining channels: normalized passthrough ---
    z2n = (z0_ref[:, cc:, :].astype(jnp.float32) - mean) * rstd     # (TB, C-cc, HW)

    # --- ChannelShuffle(groups): one reshape/transpose, no per-channel copies ---
    zc = jnp.concatenate([z1o, z2n], axis=1)                        # (TB, C, HW)
    shuffled = zc.reshape(tb, groups, cpg, hw).swapaxes(1, 2).reshape(tb, c, hw)

    # --- residual add (re-read z0 from the resident input buffer), lane-dense store ---
    o_ref[...] = (shuffled + z0_ref[...].astype(jnp.float32)).astype(o_ref.dtype)


def _pick_batch_tile(n, per_sample_bytes, target_bytes=1 << 20):
    """Largest divisor of n whose block stays under ~1 MiB, while keeping >= 2 grid
    steps whenever n > 1 (so the 'parallel' axis can shard across TensorCores)."""
    best = 1
    for cand in range(1, n + 1):
        if n % cand:
            continue
        if cand * per_sample_bytes > target_bytes:
            break
        if n // cand >= 2 or n == 1:
            best = cand
    return best


def channel_projection(z0: jax.Array,
                       w1: jax.Array, b1: jax.Array,
                       w2: jax.Array, b2: jax.Array,
                       groups: int, eps: float = 1e-5) -> jax.Array:
    """Pallas implementation of ChannelProjection.forward (NCHW input)."""
    n, c, h, w = z0.shape
    two_cc, cc = w1.shape
    assert two_cc == 2 * cc, "conv_input must map cc -> 2*cc channels"
    assert w2.shape == (cc, 2 * cc)
    assert c % groups == 0, "channels must be divisible by shuffle groups"
    hw = h * w

    # Lane-dense view: last dim is H*W (multiple of 128 for typical H, W).
    x = z0.reshape(n, c, hw)
    b1_2d = b1.reshape(2 * cc, 1)
    b2_2d = b2.reshape(cc, 1)

    itemsize = jnp.dtype(z0.dtype).itemsize
    tb = _pick_batch_tile(n, c * hw * itemsize)
    grid = (n // tb,)

    # VMEM budget: double-buffered in/out blocks + f32 intermediates + weights + margin.
    blk_io = tb * c * hw * itemsize
    blk_f32 = tb * c * hw * 4
    weight_bytes = (w1.size + b1.size + w2.size + b2.size) * 4
    vmem_needed = 4 * blk_io + 10 * blk_f32 + 2 * weight_bytes + (2 << 20)
    vmem_limit = int(min(max(vmem_needed, 16 << 20), 48 << 20))

    cost = pl.CostEstimate(
        flops=int(n * (8 * cc * cc * hw + 12 * c * hw)),
        transcendentals=int(n * 2 * cc * hw),
        bytes_accessed=int(2 * n * c * hw * itemsize + weight_bytes),
    )

    kernel = functools.partial(
        _channel_projection_kernel,
        conv_channels=cc, groups=groups, eps=eps,
    )

    out = pl.pallas_call(
        kernel,
        out_shape=jax.ShapeDtypeStruct((n, c, hw), z0.dtype),
        grid_spec=pltpu.PrefetchScalarGridSpec(
            num_scalar_prefetch=0,
            grid=grid,
            in_specs=[
                pl.BlockSpec((tb, c, hw), lambda i: (i, 0, 0)),      # z_0 batch tile
                pl.BlockSpec((2 * cc, cc), lambda i: (0, 0)),        # conv_input weight
                pl.BlockSpec((2 * cc, 1), lambda i: (0, 0)),         # conv_input bias
                pl.BlockSpec((cc, 2 * cc), lambda i: (0, 0)),        # conv_output weight
                pl.BlockSpec((cc, 1), lambda i: (0, 0)),             # conv_output bias
            ],
            out_specs=pl.BlockSpec((tb, c, hw), lambda i: (i, 0, 0)),
        ),
        compiler_params=pltpu.CompilerParams(
            dimension_semantics=("parallel",),   # no accumulation; shards across TCs
            vmem_limit_bytes=vmem_limit,
        ),
        cost_estimate=cost,
    )(x, w1, b1_2d, w2, b2_2d)

    return out.reshape(n, c, h, w)


def channel_projection_ref(z0, w1, b1, w2, b2, groups, eps=1e-5):
    """Pure-JAX reference matching the PyTorch ChannelProjection exactly."""
    n, c, h, w = z0.shape
    x = z0.astype(jnp.float32)
    mean = x.mean(axis=(1, 2, 3), keepdims=True)
    var = jnp.square(x - mean).mean(axis=(1, 2, 3), keepdims=True)
    z = (x - mean) / jnp.sqrt(var + eps)
    cc = w1.shape[1]
    z1, z2 = z[:, :cc], z[:, cc:]
    h1 = jnp.einsum('oi,nihw->nohw', w1, z1) + b1[None, :, None, None]
    h1 = h1 * jax.nn.sigmoid(h1)
    z1 = jnp.einsum('oi,nihw->nohw', w2, h1) + b2[None, :, None, None]
    zc = jnp.concatenate([z1, z2], axis=1)
    y = zc.reshape(n, groups, c // groups, h, w)
    y = jnp.transpose(y, (0, 2, 1, 3, 4)).reshape(n, c, h, w)
    return (y + x).astype(z0.dtype)


if __name__ == "__main__":
    key = jax.random.PRNGKey(0)
    n, c, h, w = 2, 4, 16, 16
    conv_channels = 2       # ChannelProjection(conv_channels=2, channels=2)
    groups = 2              # ChannelShuffle groups = `channels` arg

    k0, k1, k2, k3, k4 = jax.random.split(key, 5)
    z0 = jax.random.normal(k0, (n, c, h, w), dtype=jnp.float32)
    w1 = 0.1 * jax.random.normal(k1, (2 * conv_channels, conv_channels), dtype=jnp.float32)
    b1 = 0.1 * jax.random.normal(k2, (2 * conv_channels,), dtype=jnp.float32)
    w2 = 0.1 * jax.random.normal(k3, (conv_channels, 2 * conv_channels), dtype=jnp.float32)
    b2 = 0.1 * jax.random.normal(k4, (conv_channels,), dtype=jnp.float32)

    out = channel_projection(z0, w1, b1, w2, b2, groups)
    out = jax.block_until_ready(out)

    ref = channel_projection_ref(z0, w1, b1, w2, b2, groups)
    assert out.shape == ref.shape and out.dtype == ref.dtype
    assert bool(jnp.allclose(out, ref, atol=1e-4, rtol=1e-4)), "mismatch vs reference"

    print("KERNEL_OK")
</pallas_src>

<mosaic_0001>
module attributes {stable_mosaic.version = 11 : i64} {
  func.func @_channel_projection_kernel(%arg0: i32, %arg1: memref<1x4x256xf32, #tpu.memory_space<vmem>>, %arg2: memref<4x2xf32, #tpu.memory_space<vmem>>, %arg3: memref<4x1xf32, #tpu.memory_space<vmem>>, %arg4: memref<2x4xf32, #tpu.memory_space<vmem>>, %arg5: memref<2x1xf32, #tpu.memory_space<vmem>>, %arg6: memref<1x4x256xf32, #tpu.memory_space<vmem>>) attributes {dimension_semantics = [#tpu.dimension_semantics<parallel>], iteration_bounds = array<i64: 2>, scalar_prefetch = 0 : i64, scratch_operands = 0 : i64, tpu.core_type = #tpu.core_type<tc>, window_params = [{transform_indices = @transform_0, window_bounds = array<i64: 1, 4, 256>}, {pipeline_mode = #tpu.pipeline_mode<synchronous>, transform_indices = @transform_1, window_bounds = array<i64: 4, 2>}, {pipeline_mode = #tpu.pipeline_mode<synchronous>, transform_indices = @transform_2, window_bounds = array<i64: 4, 1>}, {pipeline_mode = #tpu.pipeline_mode<synchronous>, transform_indices = @transform_3, window_bounds = array<i64: 2, 4>}, {pipeline_mode = #tpu.pipeline_mode<synchronous>, transform_indices = @transform_4, window_bounds = array<i64: 2, 1>}, {transform_indices = @transform_5, window_bounds = array<i64: 1, 4, 256>}]} {
    %c0 = arith.constant 0 : index
    %c0_0 = arith.constant 0 : index
    %c0_1 = arith.constant 0 : index
    %0 = vector.load %arg1[%c0, %c0_0, %c0_1] : memref<1x4x256xf32, #tpu.memory_space<vmem>>, vector<1x4x256xf32>
    %cst = arith.constant dense<0.000000e+00> : vector<1xf32>
    %1 = vector.multi_reduction <add>, %0, %cst [1, 2] : vector<1x4x256xf32> to vector<1xf32>
    %2 = vector.shape_cast %1 : vector<1xf32> to vector<1x1x1xf32>
    %3 = arith.mulf %0, %0 : vector<1x4x256xf32>
    %cst_2 = arith.constant dense<0.000000e+00> : vector<1xf32>
    %4 = vector.multi_reduction <add>, %3, %cst_2 [1, 2] : vector<1x4x256xf32> to vector<1xf32>
    %5 = vector.shape_cast %4 : vector<1xf32> to vector<1x1x1xf32>
    %cst_3 = arith.constant 9.765625E-4 : f32
    %6 = vector.broadcast %cst_3 : f32 to vector<1x1x1xf32>
    %7 = arith.mulf %2, %6 : vector<1x1x1xf32>
    %cst_4 = arith.constant 9.765625E-4 : f32
    %8 = vector.broadcast %cst_4 : f32 to vector<1x1x1xf32>
    %9 = arith.mulf %5, %8 : vector<1x1x1xf32>
    %10 = arith.mulf %7, %7 : vector<1x1x1xf32>
    %11 = arith.subf %9, %10 : vector<1x1x1xf32>
    %cst_5 = arith.constant 9.99999974E-6 : f32
    %12 = vector.broadcast %cst_5 : f32 to vector<1x1x1xf32>
    %13 = arith.addf %11, %12 : vector<1x1x1xf32>
    %14 = math.rsqrt %13 : vector<1x1x1xf32>
    %c0_6 = arith.constant 0 : index
    %c0_7 = arith.constant 0 : index
    %c0_8 = arith.constant 0 : index
    %15 = vector.load %arg1[%c0_6, %c0_7, %c0_8] : memref<1x4x256xf32, #tpu.memory_space<vmem>>, vector<1x2x256xf32>
    %16 = vector.broadcast %7 : vector<1x1x1xf32> to vector<1x2x256xf32>
    %17 = arith.subf %15, %16 : vector<1x2x256xf32>
    %18 = vector.broadcast %14 : vector<1x1x1xf32> to vector<1x2x256xf32>
    %19 = arith.mulf %17, %18 : vector<1x2x256xf32>
    %c0_9 = arith.constant 0 : index
    %c0_10 = arith.constant 0 : index
    %20 = vector.load %arg2[%c0_9, %c0_10] : memref<4x2xf32, #tpu.memory_space<vmem>>, vector<4x2xf32>
    %21 = vector.shape_cast %20 : vector<4x2xf32> to vector<1x4x2xf32>
    %c0_11 = arith.constant 0 : index
    %c0_12 = arith.constant 0 : index
    %22 = vector.load %arg4[%c0_11, %c0_12] : memref<2x4xf32, #tpu.memory_space<vmem>>, vector<2x4xf32>
    %23 = vector.shape_cast %22 : vector<2x4xf32> to vector<1x2x4xf32>
    "tpu.trace_start"() <{level = 10 : i32, message = "boi,bil->bol"}> : () -> ()
    %cst_13 = arith.constant dense<0.000000e+00> : vector<1x4x256xf32>
    %24 = tpu.matmul %21, %19, %cst_13 {dimension_numbers = #tpu.dot_dimension_numbers<[2], [1], [1], [2], [0, 0, 0, 1, 1, 2], [0], [0]>} : vector<1x4x2xf32>, vector<1x2x256xf32>, vector<1x4x256xf32> -> vector<1x4x256xf32>
    "tpu.trace_stop"() : () -> ()
    %c0_14 = arith.constant 0 : index
    %c0_15 = arith.constant 0 : index
    %25 = vector.load %arg3[%c0_14, %c0_15] : memref<4x1xf32, #tpu.memory_space<vmem>>, vector<4x1xf32>
    %26 = vector.shape_cast %25 : vector<4x1xf32> to vector<1x4x1xf32>
    %27 = vector.broadcast %26 : vector<1x4x1xf32> to vector<1x4x256xf32>
    %28 = arith.addf %24, %27 : vector<1x4x256xf32>
    %29 = arith.negf %28 : vector<1x4x256xf32>
    %30 = math.exp %29 : vector<1x4x256xf32>
    %cst_16 = arith.constant 1.000000e+00 : f32
    %31 = vector.broadcast %cst_16 : f32 to vector<1x4x256xf32>
    %32 = arith.addf %31, %30 : vector<1x4x256xf32>
    %33 = arith.divf %31, %32 : vector<1x4x256xf32>
    %34 = arith.mulf %28, %33 : vector<1x4x256xf32>
    "tpu.trace_start"() <{level = 10 : i32, message = "boi,bil->bol"}> : () -> ()
    %cst_17 = arith.constant dense<0.000000e+00> : vector<1x2x256xf32>
    %35 = tpu.matmul %23, %34, %cst_17 {dimension_numbers = #tpu.dot_dimension_numbers<[2], [1], [1], [2], [0, 0, 0, 1, 1, 2], [0], [0]>} : vector<1x2x4xf32>, vector<1x4x256xf32>, vector<1x2x256xf32> -> vector<1x2x256xf32>
    "tpu.trace_stop"() : () -> ()
    %c0_18 = arith.constant 0 : index
    %c0_19 = arith.constant 0 : index
    %36 = vector.load %arg5[%c0_18, %c0_19] : memref<2x1xf32, #tpu.memory_space<vmem>>, vector<2x1xf32>
    %37 = vector.shape_cast %36 : vector<2x1xf32> to vector<1x2x1xf32>
    %38 = vector.broadcast %37 : vector<1x2x1xf32> to vector<1x2x256xf32>
    %39 = arith.addf %35, %38 : vector<1x2x256xf32>
    %c0_20 = arith.constant 0 : index
    %c2 = arith.constant 2 : index
    %c0_21 = arith.constant 0 : index
    %40 = vector.load %arg1[%c0_20, %c2, %c0_21] : memref<1x4x256xf32, #tpu.memory_space<vmem>>, vector<1x2x256xf32>
    %41 = vector.broadcast %7 : vector<1x1x1xf32> to vector<1x2x256xf32>
    %42 = arith.subf %40, %41 : vector<1x2x256xf32>
    %43 = vector.broadcast %14 : vector<1x1x1xf32> to vector<1x2x256xf32>
    %44 = arith.mulf %42, %43 : vector<1x2x256xf32>
    %45 = tpu.concatenate %39, %44 in 1 : vector<1x2x256xf32>, vector<1x2x256xf32> -> vector<1x4x256xf32>
    %46 = vector.shape_cast %45 : vector<1x4x256xf32> to vector<1x2x2x256xf32>
    %47 = tpu.transpose %46, [0, 2, 1, 3] : vector<1x2x2x256xf32> -> vector<1x2x2x256xf32>
    %48 = vector.shape_cast %47 : vector<1x2x2x256xf32> to vector<1x4x256xf32>
    %c0_22 = arith.constant 0 : index
    %c0_23 = arith.constant 0 : index
    %c0_24 = arith.constant 0 : index
    %49 = vector.load %arg1[%c0_22, %c0_23, %c0_24] : memref<1x4x256xf32, #tpu.memory_space<vmem>>, vector<1x4x256xf32>
    %50 = arith.addf %48, %49 : vector<1x4x256xf32>
    %c0_25 = arith.constant 0 : index
    %c0_26 = arith.constant 0 : index
    %c0_27 = arith.constant 0 : index
    %51 = vector.load %arg6[%c0_25, %c0_26, %c0_27] : memref<1x4x256xf32, #tpu.memory_space<vmem>>, vector<1x4x256xf32>
    tpu.vector_store %arg6[%c0_25, %c0_26, %c0_27], %50 {strides = array<i32>} : memref<1x4x256xf32, #tpu.memory_space<vmem>>, vector<1x4x256xf32>,
    return
  }
  func.func @transform_0(%arg0: i32) -> (i32, i32, i32) {
    %c0_i32 = arith.constant 0 : i32
    %c0_i32_0 = arith.constant 0 : i32
    %c0_i32_1 = arith.constant 0 : i32
    return %arg0, %c0_i32, %c0_i32_0 : i32, i32, i32
  }
  func.func @transform_1(%arg0: i32) -> (i32, i32) {
    %c0_i32 = arith.constant 0 : i32
    %c0_i32_0 = arith.constant 0 : i32
    %c0_i32_1 = arith.constant 0 : i32
    return %c0_i32, %c0_i32_0 : i32, i32
  }
  func.func @transform_2(%arg0: i32) -> (i32, i32) {
    %c0_i32 = arith.constant 0 : i32
    %c0_i32_0 = arith.constant 0 : i32
    %c0_i32_1 = arith.constant 0 : i32
    return %c0_i32, %c0_i32_0 : i32, i32
  }
  func.func @transform_3(%arg0: i32) -> (i32, i32) {
    %c0_i32 = arith.constant 0 : i32
    %c0_i32_0 = arith.constant 0 : i32
    %c0_i32_1 = arith.constant 0 : i32
    return %c0_i32, %c0_i32_0 : i32, i32
  }
  func.func @transform_4(%arg0: i32) -> (i32, i32) {
    %c0_i32 = arith.constant 0 : i32
    %c0_i32_0 = arith.constant 0 : i32
    %c0_i32_1 = arith.constant 0 : i32
    return %c0_i32, %c0_i32_0 : i32, i32
  }
  func.func @transform_5(%arg0: i32) -> (i32, i32, i32) {
    %c0_i32 = arith.constant 0 : i32
    %c0_i32_0 = arith.constant 0 : i32
    %c0_i32_1 = arith.constant 0 : i32
    return %arg0, %c0_i32, %c0_i32_0 : i32, i32, i32
  }
}

</mosaic_0001>

<bundles_post_ra>
// kernel: tpu_custom_call.1
= control target key start
LH: loop header
LB: loop body
LE: loop exit
PB: predicated region body
PF: predicated region fallthrough
CT: control target
= control target key end

     0   :  { %10 = vsyncpa [#allocation3], 0  ;;  %s1032_s0 = inlined_call_operand.hbm [shape: f32[2,4,256], index: 0, kind: input, shape index: {}]   ;;  %s1033_s1 = inlined_call_operand.vmem [shape: f32[4,2], index: 1, kind: input, shape index: {}]   ;;  %s1034_s2 = inlined_call_operand.vmem [shape: f32[4,1], index: 2, kind: input, shape index: {}]   ;;  %s1035_s3 = inlined_call_operand.vmem [shape: f32[2,4], index: 3, kind: input, shape index: {}]   ;;  %s1036_s4 = inlined_call_operand.vmem [shape: f32[2,1], index: 4, kind: input, shape index: {}]   ;;  %s1037_s5 = inlined_call_operand.hbm [shape: f32[2,4,256], index: 5, kind: output, shape index: {}]  }
   0x1   :  { %12 = vsyncpa [#allocation3 + $0x1], 0 }
   0x2   :  { %13 = vsyncpa [#allocation4], 0 }
   0x3   :  { %15 = vsyncpa [#allocation4 + $0x1], 0  ;;  %s836_s18 = smov 0   ;;  %s838_s19 = smov 0  }
   0x4   :  { %s840_s20 = smov 0   ;;  %s842_s21 = smov 0  }
   0x5 LB: > { %s857_s22 = sadd.s32 4294967295, %s798_s21   ;;  %s613_s23 = sadd.s32 4294967294, %s798_s21   ;;  %s798_s21 = sphi %s842_s21, %s1052_s21   ;;  %s794_s20 = sphi %s840_s20, %s1051_s20   ;;  %s790_s19 = sphi %s838_s19, %s1050_s19   ;;  %s786_s18 = sphi %s836_s18, %s1049_s18  }
   0x6   : > { %s861_s24 = sadd.s32 1, %s798_s21   ;;  %s28_s25 = sadd.s32 1, %s794_s20 }
   0x7   : > { %s25_s26 = ssub.s32 %s798_s21, %s861_s24  ;;  %p35_p0 = scmp.ne.s32.totalorder %s794_s20, %s790_s19 }
   0x8   : > { %p26_p1 = scmp.eq.s32.totalorder %s25_s26, 0  ;;  %p36_p2 = scmp.eq.s32.totalorder %s798_s21, 0 }
   0x9   : > { %p41_p3 = scmp.ne.s32.totalorder %s790_s19, %s786_s18  ;;  %p42_p4 = scmp.eq.s32.totalorder %s857_s22, 0 }
   0xa   : > { %s873_s27 = scalar_select %p26_p1, %s794_s20, %s28_s25  }
   0xb   : > { %p875_p5 = por %p36_p2, %p35_p0  ;;  %p879_p6 = por %p42_p4, %p41_p3 }
   0xc   : > { %p149_p7 = scmp.eq.s32.totalorder %s857_s22, 1  ;;  %p155_p8 = scmp.eq.s32.totalorder %s613_s23, 1 }
   0xd   : > { %p651_p10 = scmp.lt.s32.totalorder %s798_s21, 2  ;;  %s187_s7 = sand.u32 1, %s794_s20  }
   0xe   : > { %p886_p11 = por %p149_p7, %p35_p0  ;;  %p890_p12 = por %p155_p8, %p41_p3 }
   0xf   : > { %s637_s8 = sshll.u32 %s798_s21, 7  ;;  %s616_s9 = sshll.u32 %s187_s7, 3 }
  0x10   : > { %s1041_s30 = scalar_select %p886_p11, 1, 0 }
  0x11   : > { %s1042_s6 = scalar_select %p890_p12, 1, 0 }
  0x12   : > { %s899_s12 = scalar_lea.hbm %s1032_s0, %s637_s8  ;;  %s191_s13 = scalar_lea.vmem [#allocation2], %s616_s9 }
  0x13   : > { %s199_s14 = sshll.u32 %s191_s13, 4  ;;  %p903_p13 = pnand %p651_p10, %p875_p5  ;;  %s907_s14 = int_to_ptr.vmem [resolvable:$true] %s199_s14 }
  0x14   : > { %s188_s16 = scalar_lea.sflag [#allocation3], %s187_s7  ;;  %s702_s17 = scalar_lea.hbm %s899_s12, 128 }
  0x15   : > { %p703_p2 = scmp.ne.s32.totalorder %s899_s12, %s702_s17  ;;  %p704_p3 = pneg %p903_p13 }
  0x16   : > { %s707_s26 = scalar_lea.hbm %s1032_s0, 256  ;;  %p708_p5 = scmp.lt.u32.totalorder %s899_s12, %s1032_s0 }
  0x17   : > { %p705_p4 = pnand %p704_p3, %p703_p2  ;;  %p709_p8 = scmp.lt.u32.totalorder %s707_s26, %s702_s17 }
  0x18   : > { %p711_p9 = scmp.lt.u32.totalorder %s702_s17, %s899_s12 }
  0x19   : > { %p706_p7 = pneg %p705_p4  ;;  %p710_p10 = por %p709_p8, %p708_p5 }
  0x1b   : > { %p712_p0 = por %p711_p9, %p710_p10 }
  0x1d   : > { %p713_p1 = pnand %p712_p0, %p706_p7 }
  0x1f   : > { %716 = shalt.err (!%p713_p1)
}
  0x20   : > { %s717_s7 = scalar_lea.vmem %s907_s14, 128  ;;  %s800_s9 = smov [#allocation2]  }
  0x21   : > { %p718_p2 = scmp.ne.s32.totalorder %s907_s14, %s717_s7  ;;  %s722_s10 = sshll.u32 %s800_s9, 4  ;;  %s723_s10 = int_to_ptr.vmem [resolvable:$false] %s722_s10 }
  0x22   : > { %s724_s11 = scalar_lea.vmem %s723_s10, 256  ;;  %p725_p11 = scmp.lt.s32.totalorder %s907_s14, %s723_s10 }
  0x23   : > { %p720_p4 = pnand %p718_p2, %p704_p3  ;;  %p726_p5 = scmp.lt.s32.totalorder %s724_s11, %s717_s7 }
  0x25   : > { %p721_p12 = pneg %p720_p4  ;;  %p727_p8 = por %p726_p5, %p725_p11 }
  0x27   : > { %p728_p9 = pnand %p727_p8, %p721_p12 }
  0x29   : > { %731 = shalt.err (!%p728_p9)
}
  0x2a   : > { %646 = dma.hbm_to_vmem [thread:$0]  (!%p903_p13), %s899_s12, 128, %s907_s14, %s188_s16  }
  0x2b   : > { %p1044_p0 = scmp.lt.s32.totalorder %s798_s21, 3  ;;  %p1045_p1 = scmp.ge.s32.totalorder %s798_s21, 1 }
  0x2d   : > { %p205_p3 = pnand %p1045_p1, %p1044_p0 }
  0x2e   : > { %s941_s13 = sand.u32 (!%p205_p3), 1, %s790_s19  }
  0x2f   : > { %208 = sbr.rel (%p205_p3) target bundleno = 733 (0x2dd), region = 40  ;;  %s620_s17 = sshll.u32 (!%p205_p3), %s941_s13, 3 }
  0x30   : > { %s211_s23 = scalar_lea.sflag (!%p205_p3), [#allocation3], %s941_s13  ;;  %s947_s15 = scalar_lea.vmem (!%p205_p3), [#allocation2], %s620_s17 }
  0x36   : > { %777 = dma.done.wait (%p879_p6), %s211_s23, 128  }
  0x37   : > { %779 = vsyncadd (%p879_p6), %s211_s23, 4294967168  ;;  %vm245_vm0 = vcmask 1043456   ;;  %v241_v0 = vld [vmem:[%s947_s15] sm:$0xff]  ;;  %v801_v10 = vmov 0.0   ;;  %v802_v12 = vmov 0   ;;  %vm295_vm1 = vcmask 1041408  }
  0x38   : > { %v243_v1 = vcombine.high %v241_v0, %v241_v0  ;;  %v246_v2 = vsel %vm245_vm0, %v241_v0, 0.0  ;;  %v257_v3 = vmul.f32 %v241_v0, %v241_v0  ;;  %364 = vmatprep.mubr.f32.mxu0 %v801_v10  ;;  %465 = vmatprep.mubr.f32.mxu1 %v801_v10  ;;  %v283_v11 = vld [vmem:[%s1034_s2] sm:$0xf]  ;;  %vm291_vm2 = vcmask 15360   ;;  %s638_s7 = sshll.u32 %s857_s22, 7  ;;  %s240_s9 = scalar_lea.vmem [#allocation5], %s620_s17 }
  0x39   : > { %689 = vset.pattern.permute.xlu1 %v802_v12  ;;  %690 = vset.pattern.permute.xlu0 %v802_v12  ;;  %v385_v13 = vld [vmem:[%s1036_s4] sm:$0x3]  ;;  %v472_v33 = vld [vmem:[%s947_s15] sm:$0xcc]  ;;  %vm391_vm3 = vcmask 31744   ;;  %v486_v60 = vlaneseq  ;;  %s543_s10 = sshll.u32 %s240_s9, 4  ;;  %s988_s29 = scalar_lea.hbm %s1037_s5, %s638_s7  ;;  %s990_s10 = int_to_ptr.vmem [resolvable:$true] %s543_s10 }
  0x3a   : > { %v247_v4 = vsel %vm245_vm0, %v243_v1, 0.0  ;;  %v259_v5 = vcombine.high %v257_v3, %v257_v3  ;;  %v261_v6 = vsel %vm245_vm0, %v257_v3, 0.0  ;;  %286 = vperm.xlu1 %689, %v283_v11   ;;  %v278_v34 = vld [vmem:[%s947_s15] sm:$0x33]  ;;  %v803_v58 = vmov 1983009808  }
  0x3b   : > { %v248_v7 = vadd.f32 %v247_v4, %v246_v2  ;;  %v281_v41 = vld [vmem:[%s1033_s1] sm:$0xf]  ;;  %v484_v59 = vunpack.c.l.s4 %v803_v58  ;;  %v487_v62 = vshrl.u32 %v486_v60, 7  ;;  %v804_v3 = vmov 1934713408   ;;  %s732_s12 = scalar_lea.vmem %s990_s10, 128 }
  0x3c   : > { %v262_v8 = vsel %vm245_vm0, %v259_v5, 0.0  ;;  %v282_v57 = vld [vmem:[%s1035_s3] sm:$0x3]  ;;  %v495_v4 = vunpack.c.l.s4 %v804_v3  ;;  %p733_p6 = scmp.ne.s32.totalorder %s990_s10, %s732_s12  ;;  %p1046_p11 = scmp.ne.s32.totalorder %s1041_s30, 0 }
  0x3d   : > { %249 = vadd.xlane.f32.xlu0 %v248_v7  ;;  %v263_v9 = vadd.f32 %v262_v8, %v261_v6  ;;  %v485_v61 = vunpack.c.0.s8 %v484_v59  ;;  %s805_s22 = smov [#allocation5]  }
  0x3e   : > { %388 = vperm.xlu1 %689, %v385_v13   ;;  %v496_v12 = vunpack.c.0.s8 %v495_v4  ;;  %p734_p12 = pnand %p733_p6, %p1046_p11  ;;  %s736_s17 = sshll.u32 %s805_s22, 4  ;;  %s737_s17 = int_to_ptr.vmem [resolvable:$false] %s736_s17 }
  0x3f   : > { %v488_v8 = vsub.s32 %v485_v61, %v487_v62  ;;  %s738_s14 = scalar_lea.vmem %s737_s17, 256  ;;  %p739_p7 = scmp.lt.s32.totalorder %s990_s10, %s737_s17 }
  0x40   : > { %p735_p13 = pneg %p734_p12  ;;  %p740_p10 = scmp.lt.s32.totalorder %s738_s14, %s732_s12 }
  0x41   : > { %264 = vadd.xlane.f32.xlu0 %v263_v9 }
  0x42   : > { %p741_p2 = por %p740_p10, %p739_p7 }
  0x44   : > { %p742_p4 = pnand %p741_p2, %p735_p13 }
  0xb9   : > { %v287_v42 = vpop.permute.xlu1 %286 }
  0xbd   : > { %v389_v63 = vpop.permute.xlu1 %388 }
  0xca   : > { %v250_v14 = vpop.xlane.xlu0 %249 }
  0xcb   : > { %v251_v15 = vrot.slane %v250_v14, 4 }
  0xcd   : > { %v252_v16 = vadd.f32 %v251_v15, %v250_v14  ;;  %v499_v15 = vsub.s32 %v496_v12, %v487_v62 }
  0xce   : > { %v265_v17 = vpop.xlane.xlu0 %264 }
  0xcf   : > { %v253_v18 = vrot.slane %v252_v16, 2  ;;  %v266_v19 = vrot.slane %v265_v17, 4 }
  0xd1   : > { %v254_v20 = vadd.f32 %v253_v18, %v252_v16  ;;  %v267_v21 = vadd.f32 %v266_v19, %v265_v17  ;;  %v630_v16 = vld.sshfl [vmem:[%s947_s15] sm:$0xff pattern:$0x76325410]  ;;  %s529_s15 = scalar_lea.sflag [#allocation4], %s941_s13 }
  0xd2   : > { %v511_v19 = vcombine.high %v630_v16, %v630_v16 }
  0xd3   : > { %v255_v22 = vrot.slane %v254_v20, 1  ;;  %v268_v23 = vrot.slane %v267_v21, 2 }
  0xd5   : > { %v256_v24 = vadd.f32 %v255_v22, %v254_v20  ;;  %v269_v25 = vadd.f32 %v268_v23, %v267_v21 }
  0xd7   : > { %v272_v26 = vmul.f32 0.0009765625, %v256_v24  ;;  %v270_v27 = vrot.slane %v269_v25, 1 }
  0xd9   : > { %v271_v28 = vadd.f32 %v270_v27, %v269_v25  ;;  %v274_v29 = vmul.f32 %v272_v26, %v272_v26  ;;  %v473_v35 = vsub.f32 %v472_v33, %v272_v26  ;;  %v279_v36 = vsub.f32 %v278_v34, %v272_v26 }
  0xdb   : > { %v273_v30 = vmul.f32 0.0009765625, %v271_v28 }
  0xdd   : > { %v275_v31 = vsub.f32 %v273_v30, %v274_v29 }
  0xdf   : > { %v276_v32 = vadd.f32 1e-05, %v275_v31 }
  0xe1   : > { %692 = vrsqrt.f32 %v276_v32 }
  0xeb   : > { %v693_v37 = vpop.eup %692 }
  0xec   : > { %v280_v38 = vmul.f32 %v693_v37, %v279_v36  ;;  %v474_v39 = vmul.f32 %v693_v37, %v473_v35 }
  0xee   : > { %v290_v40 = vcombine.high %v280_v38, %v280_v38  ;;  %v476_v6 = vcombine.high %v474_v39, %v474_v39 }
  0xf0   : > { %622 = vmatprep.subr.msk.mxu0 %vm295_vm1, %v290_v40 }
  0xf1   : > { %623 = vmatpush1.msk.msra.mxu0 %vm295_vm1, %v280_v38 }
  0xf2   : > { %624 = vmatmul.mubr.msk.f32.vlgmr.msra.gmra.mrb[0].mxu0 %vm291_vm2, %v281_v41 }
 0x1c5   : > { %v366_v43 = vpop.f32.mrb[0].mxu0 }
 0x1c6   : > { %v367_v44 = vadd.f32 %v366_v43, %v287_v42  ;;  %v368_v45 = vpop.f32.mrb[1].mxu0 }
 0x1c7   : > { %v369_v46 = vadd.f32 %v368_v45, %v287_v42 }
 0x1c8   : > { %v625_v47 = vmul.f32 -1.442695, %v367_v44 }
 0x1c9   : > { %v626_v48 = vmul.f32 -1.442695, %v369_v46 }
 0x1ca   : > { %694 = vpow2.f32 %v625_v47 }
 0x1cb   : > { %696 = vpow2.f32 %v626_v48 }
 0x1d4   : > { %v695_v49 = vpop.eup %694 }
 0x1d5   : > { %v697_v50 = vpop.eup %696  ;;  %v377_v51 = vadd.f32 1.0, %v695_v49 }
 0x1d6   : > { %v378_v52 = vadd.f32 1.0, %v697_v50 }
 0x1d7   : > { %698 = vrcp.f32 %v377_v51 }
 0x1d8   : > { %700 = vrcp.f32 %v378_v52 }
 0x1e1   : > { %v699_v53 = vpop.eup %698 }
 0x1e2   : > { %v701_v54 = vpop.eup %700  ;;  %v383_v56 = vmul.f32 %v699_v53, %v367_v44 }
 0x1e3   : > { %v384_v55 = vmul.f32 %v701_v54, %v369_v46 }
 0x1e5   : > { %627 = vmatprep.subr.msk.mxu1 %vm245_vm0, %v384_v55 }
 0x1e6   : > { %628 = vmatpush1.msk.msra.mxu1 %vm245_vm0, %v383_v56 }
 0x1e7   : > { %629 = vmatmul.mubr.msk.f32.vlgmr.msra.gmra.mrb[0].mxu1 %vm391_vm3, %v282_v57 }
 0x2ba   : > { %v467_v0 = vpop.f32.mrb[0].mxu1 }
 0x2bb   : > { %v468_v1 = vadd.f32 %v467_v0, %v389_v63  ;;  %v469_v2 = vpop.f32.mrb[1].mxu1 }
 0x2bc   : > { %v470_v5 = vadd.f32 %v469_v2, %v389_v63 }
 0x2bd   : > { %v478_v7 = vsel %vm295_vm1, %v468_v1, %v474_v39 }
 0x2be   : > { %v479_v9 = vsel %vm295_vm1, %v470_v5, %v476_v6 }
 0x2bf   : > { %v482_v11 = vcombine.low %v478_v7, %v479_v9 }
 0x2c1   : > { %v489_v13 = vrot.slane %v482_v11, %v488_v8 }
 0x2c3   : > { %v490_v14 = vcombine.high %v489_v13, %v489_v13 }
 0x2c5   : > { %v493_v17 = vcombine.low %v489_v13, %v490_v14 }
 0x2c7   : > { %v500_v18 = vrot.slane %v493_v17, %v499_v15 }
 0x2c9   : > { %v501_v20 = vcombine.high %v500_v18, %v801_v10  ;;  %v514_v21 = vadd.f32 %v630_v16, %v500_v18 }
 0x2cb   : > { %v515_v22 = vadd.f32 %v511_v19, %v501_v20 }
 0x2cd   : > { %v518_v23 = vcombine.low %v514_v21, %v515_v22 }
 0x2cf   : > { %631 = vst.sshfl [vmem:[%s240_s9] sm:$0xff pattern:$0x76325410] %v518_v23 }
 0x2d0   : > { %745 = shalt.err (!%p742_p4)
}
 0x2d1   : > { %s746_s13 = scalar_lea.hbm %s988_s29, 128  ;;  %s750_s26 = scalar_lea.hbm %s1037_s5, 256 }
 0x2d2   : > { %p747_p5 = scmp.ne.s32.totalorder %s988_s29, %s746_s13  ;;  %p751_p0 = scmp.lt.u32.totalorder %s988_s29, %s1037_s5 }
 0x2d3   : > { %p752_p1 = scmp.lt.u32.totalorder %s750_s26, %s746_s13  ;;  %p754_p6 = scmp.lt.u32.totalorder %s746_s13, %s988_s29 }
 0x2d4   : > { %p748_p8 = pnand %p747_p5, %p1046_p11 }
 0x2d5   : > { %p753_p3 = por %p752_p1, %p751_p0 }
 0x2d6   : > { %p749_p9 = pneg %p748_p8 }
 0x2d7   : > { %p755_p12 = por %p754_p6, %p753_p3 }
 0x2d9   : > { %p756_p13 = pnand %p755_p12, %p749_p9 }
 0x2db   : > { %759 = shalt.err (!%p756_p13)
}
 0x2dc   : > { %641 = dma.vmem_to_hbm [thread:$0]  (%p1046_p11), %s990_s10, 128, %s988_s29, %s529_s15  }
 0x2dd PF: > { %s555_s7 = sand.u32 1, %s786_s18   ;;  %p1047_p7 = scmp.ne.s32.totalorder %s1042_s6, 0 }
 0x2de   : > { %p1048_p10 = scmp.ge.s32.totalorder %s798_s21, 2  ;;  %s556_s9 = scalar_lea.sflag [#allocation4], %s555_s7 }
 0x2e0   : > { %p648_p2 = pnand %p1048_p10, %p1047_p7 }
 0x2e2   : > { %781 = dma.done.wait (!%p648_p2), %s556_s9, 128  }
 0x2e3   : > { %783 = vsyncadd (!%p648_p2), %s556_s9, 4294967168  ;;  %p18_p4 = scmp.ge.s32.totalorder %s861_s24, 4   ;;  %s1049_s18 = smov %s790_s19 }
 0x2e4   : > { %s1050_s19 = smov %s794_s20  ;;  %s1051_s20 = smov %s873_s27 }
 0x2e5   : > { %s1052_s21 = smov %s861_s24  ;;  %20 = sbr.rel (!%p18_p4) target bundleno = 5 (0x5), region = 85 }
 0x2ec   :  { %561 = vsyncpa [#allocation3], 1 }
 0x2ed   :  { %563 = vsyncpa [#allocation3 + $0x1], 1 }
 0x2ee   :  { %564 = vsyncpa [#allocation4], 1 }
 0x2ef   :  { %566 = vsyncpa [#allocation4 + $0x1], 1 }

</bundles_post_ra>
